<compile_context>
chip_gen: v6e
topology: v6e:2x2x1
jax: 0.10.0
libtpu: 0.0.40
codegen_flags: <defaults>
</compile_context>

<pallas_src>
import functools
import math

import jax
import jax.numpy as jnp
from jax import lax
from jax.experimental import pallas as pl
from jax.experimental.pallas import tpu as pltpu


def _round_up(a, b):
    return (a + b - 1) // b * b


def _lm_head_kernel(x_ref, wdT_ref, bd_ref, g_ref, beta_ref,
                    weT_ref, bo_ref, out_ref, h_scratch, *, compute_dtype):
    j = pl.program_id(2)  # vocab-tile index within this split (innermost)

    # dense -> erf-gelu -> LayerNorm is vocab-tile independent: compute once
    # per (split, M tile) at the first vocab step, keep resident in VMEM.
    @pl.when(j == 0)
    def _():
        xb = x_ref[...].astype(compute_dtype)
        h = jnp.dot(xb, wdT_ref[...], preferred_element_type=jnp.float32)
        h = h + bd_ref[...]
        # exact erf-based gelu (matches the PyTorch reference), f32 math
        h = h * 0.5 * (1.0 + lax.erf(h * jnp.float32(1.0 / math.sqrt(2.0))))
        # LayerNorm over the hidden axis, eps = 1e-12
        mean = jnp.mean(h, axis=-1, keepdims=True)
        var = jnp.mean(jnp.square(h - mean), axis=-1, keepdims=True)
        h = (h - mean) * lax.rsqrt(var + jnp.float32(1e-12))
        h = h * g_ref[...] + beta_ref[...]
        h_scratch[...] = h.astype(h_scratch.dtype)

    # Decoder: tied-embedding projection for this (M tile, vocab tile).
    logits = jnp.dot(h_scratch[...], weT_ref[...],
                     preferred_element_type=jnp.float32)
    out_ref[...] = (logits + bo_ref[...]).astype(out_ref.dtype)


def prepare_mlm_head_weights(params, *, vocab_tile=1024, vocab_splits=1,
                             compute_dtype=jnp.bfloat16):
    """Hoist per-call weight prep (transpose / cast / pad) out of the hot path.

    Cache the returned dict and pass it via bert_mlm_head(..., prepared=...).

    params (PyTorch layout):
      dense_w [H, H], dense_b [H], ln_g [H], ln_b [H],
      emb_w   [V, H] (tied embedding matrix), out_b [V].
    """
    assert vocab_tile % 128 == 0, "vocab_tile must be a multiple of 128"
    H = params["dense_w"].shape[0]
    V = params["emb_w"].shape[0]
    compute_dtype = jnp.dtype(compute_dtype)

    tv = min(vocab_tile, _round_up(V, 128))              # vocab cols per tile
    vocab_splits = max(1, min(int(vocab_splits), -(-V // tv)))
    v_pad = _round_up(V, tv * vocab_splits)

    wdT = params["dense_w"].astype(compute_dtype).T      # [H, H]: h = x @ wdT
    bd = params["dense_b"].reshape(1, H).astype(jnp.float32)
    gamma = params["ln_g"].reshape(1, H).astype(jnp.float32)
    beta = params["ln_b"].reshape(1, H).astype(jnp.float32)
    weT = params["emb_w"].astype(compute_dtype).T        # [H, V]
    bo = params["out_b"].reshape(1, V).astype(jnp.float32)
    if v_pad != V:
        weT = jnp.pad(weT, ((0, 0), (0, v_pad - V)))
        bo = jnp.pad(bo, ((0, 0), (0, v_pad - V)))

    return dict(wdT=wdT, bd=bd, gamma=gamma, beta=beta, weT=weT, bo=bo,
                H=H, V=V, v_pad=v_pad, tv=tv, vocab_splits=vocab_splits,
                compute_dtype=compute_dtype)


def _invariant_spec(shape, index_map, single_buffer):
    if single_buffer:
        try:
            return pl.BlockSpec(shape, index_map,
                                pipeline_mode=pl.Buffered(buffer_count=1))
        except TypeError:      # older jax without pipeline_mode / Buffered
            pass
    return pl.BlockSpec(shape, index_map)


def bert_mlm_head(x, params=None, *, prepared=None, tm=512, vocab_tile=1024,
                  vocab_splits=1, compute_dtype=jnp.bfloat16, out_dtype=None,
                  single_buffer_invariants=True, vmem_limit_bytes=None):
    """BertOnlyMLMHead forward: x [B, S, H] -> logits [B, S, V].

    Either pass raw `params` (PyTorch layout, see prepare_mlm_head_weights) or
    a cached `prepared` dict.  compute_dtype is the MXU operand dtype for both
    matmuls (f32 accumulation either way); out_dtype defaults to compute_dtype
    (bf16 logits by default — pass jnp.float32 for training-grade logits).
    """
    if prepared is None:
        assert params is not None, "need params or prepared weights"
        prepared = prepare_mlm_head_weights(
            params, vocab_tile=vocab_tile, vocab_splits=vocab_splits,
            compute_dtype=compute_dtype)

    B, S, H = x.shape
    assert H == prepared["H"]
    compute_dtype = prepared["compute_dtype"]
    V, v_pad = prepared["V"], prepared["v_pad"]
    tv, vsplits = prepared["tv"], prepared["vocab_splits"]
    out_dtype = compute_dtype if out_dtype is None else jnp.dtype(out_dtype)

    # --- M tiling / padding (shape-robust) ----------------------------------
    M = B * S
    tm = max(8, _round_up(tm, 8))
    tm_eff = min(tm, _round_up(M, 8))          # rows per M tile (multiple of 8)
    m_pad = _round_up(M, tm_eff)

    # x stays in its input dtype (cast to compute_dtype happens in-kernel).
    x2d = x.reshape(M, H)
    if m_pad != M:
        # Zero-padded rows produce h = LN bias after the transform and are
        # sliced off below — do not remove the final [:M] slice.
        x2d = jnp.pad(x2d, ((0, m_pad - M), (0, 0)))

    j_per_split = v_pad // (tv * vsplits)
    grid = (vsplits, m_pad // tm_eff, j_per_split)

    # --- VMEM budget ---------------------------------------------------------
    def _isz(dt):
        return jnp.dtype(dt).itemsize

    if vmem_limit_bytes is None:
        inv_buf = 1 if single_buffer_invariants else 2
        est = (2 * tm_eff * H * _isz(x2d.dtype)                 # x (double buf)
               + inv_buf * (H * H * _isz(compute_dtype) + 3 * H * 4)  # wd/b/ln
               + 2 * (H * tv * _isz(compute_dtype) + tv * 4)    # weT / bo
               + 2 * tm_eff * tv * _isz(out_dtype)              # out
               + tm_eff * H * _isz(compute_dtype)               # h scratch
               + 4 * tm_eff * H * 4)                            # f32 transform temps
        vmem_limit_bytes = min(max(int(est * 1.5) + (4 << 20), 32 << 20),
                               64 << 20)

    # --- specs ---------------------------------------------------------------
    in_specs = [
        pl.BlockSpec((tm_eff, H), lambda s, i, j: (i, 0)),                # x
        _invariant_spec((H, H), lambda s, i, j: (0, 0),
                        single_buffer_invariants),                        # wdT
        _invariant_spec((1, H), lambda s, i, j: (0, 0),
                        single_buffer_invariants),                        # bd
        _invariant_spec((1, H), lambda s, i, j: (0, 0),
                        single_buffer_invariants),                        # gamma
        _invariant_spec((1, H), lambda s, i, j: (0, 0),
                        single_buffer_invariants),                        # beta
        pl.BlockSpec((H, tv), lambda s, i, j: (0, s * j_per_split + j)),  # weT
        pl.BlockSpec((1, tv), lambda s, i, j: (0, s * j_per_split + j)),  # bo
    ]
    out_specs = pl.BlockSpec((tm_eff, tv),
                             lambda s, i, j: (i, s * j_per_split + j))

    kernel = functools.partial(_lm_head_kernel, compute_dtype=compute_dtype)

    out = pl.pallas_call(
        kernel,
        out_shape=jax.ShapeDtypeStruct((m_pad, v_pad), out_dtype),
        grid_spec=pltpu.PrefetchScalarGridSpec(
            num_scalar_prefetch=0,
            grid=grid,
            in_specs=in_specs,
            out_specs=out_specs,
            scratch_shapes=[pltpu.VMEM((tm_eff, H), compute_dtype)],
        ),
        compiler_params=pltpu.CompilerParams(
            # vocab-split and M axes are megacore-shardable; innermost vocab
            # axis stays sequential because of the j==0 scratch init.
            dimension_semantics=("parallel", "parallel", "arbitrary"),
            vmem_limit_bytes=vmem_limit_bytes),
    )(x2d, prepared["wdT"], prepared["bd"], prepared["gamma"],
      prepared["beta"], prepared["weT"], prepared["bo"])

    return out[:M, :V].reshape(B, S, V)


# --------------------------- reference & tests -------------------------------
def _reference(x, params):
    h = x @ params["dense_w"].T + params["dense_b"]
    h = h * 0.5 * (1.0 + lax.erf(h / jnp.float32(math.sqrt(2.0))))
    mean = jnp.mean(h, axis=-1, keepdims=True)
    var = jnp.mean((h - mean) ** 2, axis=-1, keepdims=True)
    h = (h - mean) / jnp.sqrt(var + 1e-12)
    h = h * params["ln_g"] + params["ln_b"]
    return h @ params["emb_w"].T + params["out_b"]


def _make_params(key, H, V):
    k1, k2, k3, k4, k5 = jax.random.split(key, 5)
    return {
        "dense_w": 0.02 * jax.random.normal(k1, (H, H), jnp.float32),
        "dense_b": 0.01 * jax.random.normal(k2, (H,), jnp.float32),
        "ln_g": 1.0 + 0.01 * jax.random.normal(k3, (H,), jnp.float32),
        "ln_b": 0.01 * jax.random.normal(k4, (H,), jnp.float32),
        "emb_w": 0.02 * jax.random.normal(k5, (V, H), jnp.float32),
        "out_b": jnp.zeros((V,), jnp.float32),
    }


if __name__ == "__main__":
    key = jax.random.PRNGKey(0)

    # --- test 1: aligned shapes, exact f32 path, hoisted-weights API --------
    B, S, H, V = 2, 8, 128, 512
    params = _make_params(key, H, V)
    x = jax.random.normal(jax.random.PRNGKey(42), (B, S, H), jnp.float32)
    ref = _reference(x, params)

    prepared_f32 = prepare_mlm_head_weights(params, vocab_tile=128,
                                            compute_dtype=jnp.float32)
    logits = bert_mlm_head(x, prepared=prepared_f32, tm=256,
                           out_dtype=jnp.float32)
    logits = jax.block_until_ready(logits)
    assert logits.shape == (B, S, V)
    assert jnp.allclose(logits, ref, atol=2e-4, rtol=2e-4), "f32 mismatch"

    # --- test 2: default bf16 compute + bf16 logits (f32 accumulation) ------
    logits_bf16 = bert_mlm_head(x, params)          # tm=512, vocab_tile=1024
    logits_bf16 = jax.block_until_ready(logits_bf16)
    assert logits_bf16.dtype == jnp.bfloat16
    assert jnp.allclose(logits_bf16.astype(jnp.float32), ref,
                        atol=5e-2, rtol=5e-2), "bf16 mismatch"

    # --- test 3: ragged M / V + multiple M tiles + 2-way vocab split --------
    B2, S2, V2 = 2, 10, 320        # M = 20 (pads to 24), V = 320 (pads to 512)
    params2 = _make_params(jax.random.PRNGKey(1), H, V2)
    x2 = jax.random.normal(jax.random.PRNGKey(43), (B2, S2, H), jnp.float32)
    logits2 = bert_mlm_head(x2, params2, tm=8, vocab_tile=128, vocab_splits=2,
                            compute_dtype=jnp.float32, out_dtype=jnp.float32,
                            single_buffer_invariants=False)
    logits2 = jax.block_until_ready(logits2)
    ref2 = _reference(x2, params2)
    assert logits2.shape == (B2, S2, V2)
    assert jnp.allclose(logits2, ref2, atol=2e-4, rtol=2e-4), "ragged mismatch"

    print("KERNEL_OK")
</pallas_src>

<mosaic_0001>
module attributes {stable_mosaic.version = 11 : i64} {
  func.func @_lm_head_kernel(%arg0: i32, %arg1: i32, %arg2: i32, %arg3: memref<16x128xf32, #tpu.memory_space<vmem>>, %arg4: memref<128x128xf32, #tpu.memory_space<vmem>>, %arg5: memref<1x128xf32, #tpu.memory_space<vmem>>, %arg6: memref<1x128xf32, #tpu.memory_space<vmem>>, %arg7: memref<1x128xf32, #tpu.memory_space<vmem>>, %arg8: memref<128x128xf32, #tpu.memory_space<vmem>>, %arg9: memref<1x128xf32, #tpu.memory_space<vmem>>, %arg10: memref<16x128xf32, #tpu.memory_space<vmem>>, %arg11: memref<16x128xf32, #tpu.memory_space<vmem>>) attributes {dimension_semantics = [#tpu.dimension_semantics<parallel>, #tpu.dimension_semantics<parallel>, #tpu.dimension_semantics<arbitrary>], iteration_bounds = array<i64: 1, 1, 4>, scalar_prefetch = 0 : i64, scratch_operands = 1 : i64, tpu.core_type = #tpu.core_type<tc>, window_params = [{transform_indices = @transform_0, window_bounds = array<i64: 16, 128>}, {pipeline_mode = #tpu.pipeline_mode<synchronous>, transform_indices = @transform_1, window_bounds = array<i64: 128, 128>}, {pipeline_mode = #tpu.pipeline_mode<synchronous>, transform_indices = @transform_2, window_bounds = array<i64: 1, 128>}, {pipeline_mode = #tpu.pipeline_mode<synchronous>, transform_indices = @transform_3, window_bounds = array<i64: 1, 128>}, {pipeline_mode = #tpu.pipeline_mode<synchronous>, transform_indices = @transform_4, window_bounds = array<i64: 1, 128>}, {transform_indices = @transform_5, window_bounds = array<i64: 128, 128>}, {transform_indices = @transform_6, window_bounds = array<i64: 1, 128>}, {transform_indices = @transform_7, window_bounds = array<i64: 16, 128>}]} {
    %c0_i32 = arith.constant 0 : i32
    %0 = arith.cmpi eq, %arg2, %c0_i32 : i32
    %1 = arith.extui %0 : i1 to i32
    %c0_i32_0 = arith.constant 0 : i32
    %2 = arith.cmpi ne, %1, %c0_i32_0 : i32
    scf.if %2 {
      %c0_8 = arith.constant 0 : index
      %c0_9 = arith.constant 0 : index
      %10 = vector.load %arg3[%c0_8, %c0_9] : memref<16x128xf32, #tpu.memory_space<vmem>>, vector<16x128xf32>
      %c0_10 = arith.constant 0 : index
      %c0_11 = arith.constant 0 : index
      %11 = vector.load %arg4[%c0_10, %c0_11] : memref<128x128xf32, #tpu.memory_space<vmem>>, vector<128x128xf32>
      %cst_12 = arith.constant dense<0.000000e+00> : vector<16x128xf32>
      %12 = tpu.matmul %10, %11, %cst_12 {dimension_numbers = #tpu.dot_dimension_numbers<[1], [0], [0], [1], [0, 0, 1, 1], [], []>} : vector<16x128xf32>, vector<128x128xf32>, vector<16x128xf32> -> vector<16x128xf32>
      %c0_13 = arith.constant 0 : index
      %c0_14 = arith.constant 0 : index
      %13 = vector.load %arg5[%c0_13, %c0_14] : memref<1x128xf32, #tpu.memory_space<vmem>>, vector<1x128xf32>
      %14 = vector.broadcast %13 : vector<1x128xf32> to vector<16x128xf32>
      %15 = arith.addf %12, %14 : vector<16x128xf32>
      %cst_15 = arith.constant 5.000000e-01 : f32
      %16 = vector.broadcast %cst_15 : f32 to vector<16x128xf32>
      %17 = arith.mulf %15, %16 : vector<16x128xf32>
      %cst_16 = arith.constant 0.707106769 : f32
      %18 = vector.broadcast %cst_16 : f32 to vector<16x128xf32>
      %19 = arith.mulf %15, %18 : vector<16x128xf32>
      %20 = math.erf %19 : vector<16x128xf32>
      %cst_17 = arith.constant 1.000000e+00 : f32
      %21 = vector.broadcast %cst_17 : f32 to vector<16x128xf32>
      %22 = arith.addf %21, %20 : vector<16x128xf32>
      %23 = arith.mulf %17, %22 : vector<16x128xf32>
      %cst_18 = arith.constant dense<0.000000e+00> : vector<16xf32>
      %24 = vector.multi_reduction <add>, %23, %cst_18 [1] : vector<16x128xf32> to vector<16xf32>
      %25 = vector.shape_cast %24 : vector<16xf32> to vector<16x1xf32>
      %cst_19 = arith.constant 1.280000e+02 : f32
      %26 = vector.broadcast %cst_19 : f32 to vector<16x1xf32>
      %27 = arith.divf %25, %26 : vector<16x1xf32>
      %28 = vector.broadcast %27 : vector<16x1xf32> to vector<16x128xf32>
      %29 = arith.subf %23, %28 : vector<16x128xf32>
      %30 = arith.mulf %29, %29 : vector<16x128xf32>
      %cst_20 = arith.constant dense<0.000000e+00> : vector<16xf32>
      %31 = vector.multi_reduction <add>, %30, %cst_20 [1] : vector<16x128xf32> to vector<16xf32>
      %32 = vector.shape_cast %31 : vector<16xf32> to vector<16x1xf32>
      %cst_21 = arith.constant 1.280000e+02 : f32
      %33 = vector.broadcast %cst_21 : f32 to vector<16x1xf32>
      %34 = arith.divf %32, %33 : vector<16x1xf32>
      %35 = vector.broadcast %27 : vector<16x1xf32> to vector<16x128xf32>
      %36 = arith.subf %23, %35 : vector<16x128xf32>
      %cst_22 = arith.constant 9.99999996E-13 : f32
      %37 = vector.broadcast %cst_22 : f32 to vector<16x1xf32>
      %38 = arith.addf %34, %37 : vector<16x1xf32>
      %39 = math.rsqrt %38 : vector<16x1xf32>
      %40 = vector.broadcast %39 : vector<16x1xf32> to vector<16x128xf32>
      %41 = arith.mulf %36, %40 : vector<16x128xf32>
      %c0_23 = arith.constant 0 : index
      %c0_24 = arith.constant 0 : index
      %42 = vector.load %arg6[%c0_23, %c0_24] : memref<1x128xf32, #tpu.memory_space<vmem>>, vector<1x128xf32>
      %43 = vector.broadcast %42 : vector<1x128xf32> to vector<16x128xf32>
      %44 = arith.mulf %41, %43 : vector<16x128xf32>
      %c0_25 = arith.constant 0 : index
      %c0_26 = arith.constant 0 : index
      %45 = vector.load %arg7[%c0_25, %c0_26] : memref<1x128xf32, #tpu.memory_space<vmem>>, vector<1x128xf32>
      %46 = vector.broadcast %45 : vector<1x128xf32> to vector<16x128xf32>
      %47 = arith.addf %44, %46 : vector<16x128xf32>
      %c0_27 = arith.constant 0 : index
      %c0_28 = arith.constant 0 : index
      %48 = vector.load %arg11[%c0_27, %c0_28] : memref<16x128xf32, #tpu.memory_space<vmem>>, vector<16x128xf32>
      tpu.vector_store %arg11[%c0_27, %c0_28], %47 {strides = array<i32>} : memref<16x128xf32, #tpu.memory_space<vmem>>, vector<16x128xf32>,
    } else {
    }
    %c0 = arith.constant 0 : index
    %c0_1 = arith.constant 0 : index
    %3 = vector.load %arg11[%c0, %c0_1] : memref<16x128xf32, #tpu.memory_space<vmem>>, vector<16x128xf32>
    %c0_2 = arith.constant 0 : index
    %c0_3 = arith.constant 0 : index
    %4 = vector.load %arg8[%c0_2, %c0_3] : memref<128x128xf32, #tpu.memory_space<vmem>>, vector<128x128xf32>
    %cst = arith.constant dense<0.000000e+00> : vector<16x128xf32>
    %5 = tpu.matmul %3, %4, %cst {dimension_numbers = #tpu.dot_dimension_numbers<[1], [0], [0], [1], [0, 0, 1, 1], [], []>} : vector<16x128xf32>, vector<128x128xf32>, vector<16x128xf32> -> vector<16x128xf32>
    %c0_4 = arith.constant 0 : index
    %c0_5 = arith.constant 0 : index
    %6 = vector.load %arg9[%c0_4, %c0_5] : memref<1x128xf32, #tpu.memory_space<vmem>>, vector<1x128xf32>
    %7 = vector.broadcast %6 : vector<1x128xf32> to vector<16x128xf32>
    %8 = arith.addf %5, %7 : vector<16x128xf32>
    %c0_6 = arith.constant 0 : index
    %c0_7 = arith.constant 0 : index
    %9 = vector.load %arg10[%c0_6, %c0_7] : memref<16x128xf32, #tpu.memory_space<vmem>>, vector<16x128xf32>
    tpu.vector_store %arg10[%c0_6, %c0_7], %8 {strides = array<i32>} : memref<16x128xf32, #tpu.memory_space<vmem>>, vector<16x128xf32>,
    return
  }
  func.func @transform_0(%arg0: i32, %arg1: i32, %arg2: i32) -> (i32, i32) {
    %c0_i32 = arith.constant 0 : i32
    %c0_i32_0 = arith.constant 0 : i32
    return %arg1, %c0_i32 : i32, i32
  }
  func.func @transform_1(%arg0: i32, %arg1: i32, %arg2: i32) -> (i32, i32) {
    %c0_i32 = arith.constant 0 : i32
    %c0_i32_0 = arith.constant 0 : i32
    %c0_i32_1 = arith.constant 0 : i32
    return %c0_i32, %c0_i32_0 : i32, i32
  }
  func.func @transform_2(%arg0: i32, %arg1: i32, %arg2: i32) -> (i32, i32) {
    %c0_i32 = arith.constant 0 : i32
    %c0_i32_0 = arith.constant 0 : i32
    %c0_i32_1 = arith.constant 0 : i32
    return %c0_i32, %c0_i32_0 : i32, i32
  }
  func.func @transform_3(%arg0: i32, %arg1: i32, %arg2: i32) -> (i32, i32) {
    %c0_i32 = arith.constant 0 : i32
    %c0_i32_0 = arith.constant 0 : i32
    %c0_i32_1 = arith.constant 0 : i32
    return %c0_i32, %c0_i32_0 : i32, i32
  }
  func.func @transform_4(%arg0: i32, %arg1: i32, %arg2: i32) -> (i32, i32) {
    %c0_i32 = arith.constant 0 : i32
    %c0_i32_0 = arith.constant 0 : i32
    %c0_i32_1 = arith.constant 0 : i32
    return %c0_i32, %c0_i32_0 : i32, i32
  }
  func.func @transform_5(%arg0: i32, %arg1: i32, %arg2: i32) -> (i32, i32) {
    %c4_i32 = arith.constant 4 : i32
    %0 = arith.muli %arg0, %c4_i32 : i32
    %1 = arith.addi %0, %arg2 : i32
    %c0_i32 = arith.constant 0 : i32
    %c0_i32_0 = arith.constant 0 : i32
    return %c0_i32, %1 : i32, i32
  }
  func.func @transform_6(%arg0: i32, %arg1: i32, %arg2: i32) -> (i32, i32) {
    %c4_i32 = arith.constant 4 : i32
    %0 = arith.muli %arg0, %c4_i32 : i32
    %1 = arith.addi %0, %arg2 : i32
    %c0_i32 = arith.constant 0 : i32
    %c0_i32_0 = arith.constant 0 : i32
    return %c0_i32, %1 : i32, i32
  }
  func.func @transform_7(%arg0: i32, %arg1: i32, %arg2: i32) -> (i32, i32) {
    %c4_i32 = arith.constant 4 : i32
    %0 = arith.muli %arg0, %c4_i32 : i32
    %1 = arith.addi %0, %arg2 : i32
    %c0_i32 = arith.constant 0 : i32
    return %arg1, %1 : i32, i32
  }
}

</mosaic_0001>

<bundles_post_ra>
// kernel: tpu_custom_call.1
= control target key start
LH: loop header
LB: loop body
LE: loop exit
PB: predicated region body
PF: predicated region fallthrough
CT: control target
= control target key end

     0   :  { %s1484_s0 = inlined_call_operand.hbm [shape: f32[16,128], index: 0, kind: input, shape index: {}]   ;;  %s1485_s1 = inlined_call_operand.hbm [shape: f32[128,128], index: 1, kind: input, shape index: {}]   ;;  %s1486_s2 = inlined_call_operand.vmem [shape: f32[1,128], index: 2, kind: input, shape index: {}]   ;;  %s1487_s3 = inlined_call_operand.vmem [shape: f32[1,128], index: 3, kind: input, shape index: {}]   ;;  %s1488_s4 = inlined_call_operand.vmem [shape: f32[1,128], index: 4, kind: input, shape index: {}]   ;;  %s1489_s5 = inlined_call_operand.hbm [shape: f32[128,512], index: 5, kind: input, shape index: {}]   ;;  %s1490_s6 = inlined_call_operand.vmem [shape: f32[1,512], index: 6, kind: input, shape index: {}]   ;;  %s1491_s7 = inlined_call_operand.hbm [shape: f32[16,512], index: 7, kind: output, shape index: {}]  }
   0x1   :  { %1500 = sst [smem:[#allocation17_spill]] %s1484_s0 }
   0x2   :  { %1501 = sst [smem:[#allocation18_spill]] %s1485_s1 }
   0x3   :  { %12 = vsyncpa [#allocation4], 0 }
   0x4   :  { %13 = vsyncpa [#allocation7], 0 }
   0x5   :  { %14 = vsyncpa [#allocation5], 0 }
   0x6   :  { %16 = vsyncpa [#allocation5 + $0x1], 0  ;;  %s1238_s24 = smov 0   ;;  %s1240_s25 = smov 0  }
   0x7   :  { %s1242_s26 = smov 0   ;;  %s1244_s27 = smov 0  }
   0x8   :  { %s1246_s28 = smov 0   ;;  %s1248_s29 = smov 0  }
   0x9 LB: > { %1502 = sst [smem:[#allocation14_spill]] %s1166_s24  ;;  %s1269_s30 = sadd.s32 4294967295, %s1186_s29   ;;  %s1186_s29 = sphi %s1248_s29, %s22_s29   ;;  %s1182_s28 = sphi %s1246_s28, %s1530_s28   ;;  %s1178_s27 = sphi %s1244_s27, %s1529_s27   ;;  %s1174_s26 = sphi %s1242_s26, %s1528_s26   ;;  %s1170_s25 = sphi %s1240_s25, %s1527_s25   ;;  %s1166_s24 = sphi %s1238_s24, %s1526_s24  }
   0xa   : > { %1503 = sst [smem:[#allocation15_spill]] %s1186_s29  ;;  %s794_s8 = sadd.s32 4294967294, %s1186_s29  }
   0xb   : > { %p169_p0 = scmp.ne.s32.totalorder %s1174_s26, %s1170_s25  ;;  %p170_p1 = scmp.eq.s32.totalorder %s1186_s29, 0 }
   0xc   : > { %p175_p2 = scmp.ne.s32.totalorder %s1170_s25, %s1166_s24  ;;  %p1492_p3 = scmp.eq.s32.totalorder %s1269_s30, 0 }
   0xd   : > { %p235_p4 = scmp.eq.s32.totalorder %s1269_s30, 3  ;;  %p1280_p5 = por %p170_p1, %p169_p0 }
   0xe   : > { %p241_p6 = scmp.eq.s32.totalorder %s794_s8, 3  ;;  %p1286_p7 = por %p1492_p3, %p175_p2 }
   0xf   : > { %p1290_p8 = por %p235_p4, %p169_p0  ;;  %p795_p10 = scmp.ge.s32.totalorder %s1186_s29, 1 }
  0x10   : > { %p1294_p9 = por %p241_p6, %p175_p2  ;;  %p248_p11 = scmp.lt.s32.totalorder %s1186_s29, 5 }
  0x11   : > { %s1506_s12 = scalar_select %p1290_p8, 1, 0 }
  0x12   : > { %s1507_s13 = scalar_select %p1294_p9, 1, 0 }
  0x13   : > { %p1300_p12 = pnand %p795_p10, %p248_p11  ;;  %s1188_s15 = smov [#allocation3]  }
  0x14   : > { %1508 = sst [smem:[#allocation16_spill]] %s1507_s13  ;;  %s263_s16 = sshll.u32 %s1188_s15, 4  ;;  %s264_s16 = int_to_ptr.vmem [resolvable:$true] %s263_s16 }
  0x15   : > { %p933_p13 = pneg %p1300_p12  ;;  %p950_p0 = scmp.lt.s32.totalorder %s1186_s29, 4 }
  0x16   : > { %s1189_s18 = smov [#allocation6]   ;;  %s1029_s21 = scalar_lea.vmem %s264_s16, 256 }
  0x17   : > { %p1309_p1 = pnand %p933_p13, %p1492_p3  ;;  %s276_s19 = sshll.u32 %s1189_s18, 4  ;;  %s277_s19 = int_to_ptr.vmem [resolvable:$true] %s276_s19 }
  0x18   : > { %p1315_p2 = pnand %p950_p0, %p1280_p5  ;;  %p1030_p6 = scmp.ne.s32.totalorder %s264_s16, %s1029_s21 }
  0x19   : > { %p1020_p4 = pneg %p1309_p1  ;;  %p1037_p13 = scmp.lt.s32.totalorder %s264_s16, %s264_s16 }
  0x1a   : > { %p1038_p3 = scmp.lt.s32.totalorder %s1029_s21, %s1029_s21 }
  0x1b   : > { %p1032_p10 = pnand %p1030_p6, %p1020_p4 }
  0x1c   : > { %p1039_p9 = por %p1038_p3, %p1037_p13 }
  0x1d   : > { %p1033_p11 = pneg %p1032_p10 }
  0x1f   : > { %p1040_p8 = pnand %p1039_p9, %p1033_p11 }
  0x21   : > { %1043 = shalt.err (!%p1040_p8)
}
  0x22   : > { %s1496_s22 = smov 128   ;;  %s1497_s23 = smov 8  }
  0x23   : > { %s1512_s0 = sld [smem:[#allocation17_spill]]  ;;  %s1055_s15 = scalar_lea.vmem %s277_s19, 2048 }
  0x24   : > { %p1056_p5 = scmp.ne.s32.totalorder %s277_s19, %s1055_s15  ;;  %p1063_p9 = scmp.lt.s32.totalorder %s277_s19, %s277_s19 }
  0x25   : > { %p1064_p8 = scmp.lt.s32.totalorder %s1055_s15, %s1055_s15 }
  0x26   : > { %p1058_p0 = pnand %p1056_p5, %p1020_p4 }
  0x27   : > { %p1065_p6 = por %p1064_p8, %p1063_p9 }
  0x28   : > { %p1059_p3 = pneg %p1058_p0 }
  0x29   : > { %936 = dma.hbm_to_vmem [thread:$0]  (!%p1309_p1), %s1512_s0, 256, %s264_s16, [#allocation4], %s1496_s22, %s1496_s22, %s1497_s23  }
  0x2a   : > { %p1066_p10 = pnand %p1065_p6, %p1059_p3 }
  0x2c   : > { %1069 = shalt.err (!%p1066_p10)
}
  0x2d   : > { %s1513_s1 = sld [smem:[#allocation18_spill]]  ;;  %s34_s16 = sadd.s32 1, %s1182_s28 }
  0x2e   : > { %s299_s8 = sand.u32 1, %s1186_s29   ;;  %p35_p4 = scmp.ge.s32.totalorder %s34_s16, 4 }
  0x2f   : > { %s301_s10 = sand.u32 1, %s1174_s26   ;;  %s800_s17 = sshll.u32 %s1182_s28, 7 }
  0x30   : > { %s1532_s16 = smov (%p35_p4, %s34_s16), 0  ;;  %s799_s15 = sshll.u32 %s301_s10, 7 }
  0x31   : > { %s310_s21 = scalar_lea.hbm %s1489_s5, %s800_s17  ;;  %s159_s0 = ssub.s32 %s1182_s28, %s1532_s16 }
  0x32   : > { %p160_p11 = scmp.eq.s32.totalorder %s159_s0, 0  ;;  %s303_s13 = scalar_lea.vmem [#allocation8], %s799_s15 }
  0x33   : > { %939 = dma.hbm_to_vmem [thread:$0]  (!%p1309_p1), %s1513_s1, 2048, %s277_s19, [#allocation7], %s1496_s22, %s1496_s22, %s1497_s23  }
  0x34   : > { %s311_s24 = sshll.u32 %s303_s13, 4  ;;  %s1514_s19 = sadd.s32 1, %s1174_s26  ;;  %s312_s24 = int_to_ptr.vmem [resolvable:$true] %s311_s24 }
  0x35   : > { %s1357_s22 = scalar_select %p160_p11, %s1174_s26, %s1514_s19  }
  0x36   : > { %s300_s23 = scalar_lea.sflag [#allocation4], %s299_s8  ;;  %p1072_p1 = pneg %p1315_p2 }
  0x37   : > { %s1083_s1 = scalar_lea.vmem %s312_s24, 2048  ;;  %s1192_s10 = smov [#allocation8]  }
  0x38   : > { %p1084_p13 = scmp.ne.s32.totalorder %s312_s24, %s1083_s1  ;;  %s1088_s29 = sshll.u32 %s1192_s10, 4  ;;  %s1089_s29 = int_to_ptr.vmem [resolvable:$false] %s1088_s29 }
  0x39   : > { %s1090_s9 = scalar_lea.vmem %s1089_s29, 4096  ;;  %p1091_p3 = scmp.lt.s32.totalorder %s312_s24, %s1089_s29 }
  0x3a   : > { %p1086_p5 = pnand %p1084_p13, %p1072_p1  ;;  %p1092_p9 = scmp.lt.s32.totalorder %s1090_s9, %s1083_s1 }
  0x3c   : > { %p1087_p0 = pneg %p1086_p5  ;;  %p1093_p8 = por %p1092_p9, %p1091_p3 }
  0x3e   : > { %p1094_p6 = pnand %p1093_p8, %p1087_p0 }
  0x40   : > { %1097 = shalt.err (!%p1094_p6)
}
  0x41   : > { %s1193_s0 = smov 512   ;;  %s1515_s13 = smov 8  }
  0x42   : > { %s1516_s8 = smov 128   ;;  %333 = sbr.rel (%p1300_p12) target bundleno = 894 (0x37e), region = 48 }
  0x43   : > { %943 = dma.hbm_to_vmem [thread:$0]  (!%p1315_p2), %s310_s21, 2048, %s312_s24, %s300_s23, %s1193_s0, %s1516_s8, %s1515_s13  }
  0x44   : > { %p1517_p10 = scmp.eq.s32.totalorder (!%p1300_p12), %s1269_s30, 0 }
  0x47   : > { %1149 = dma.done.wait (%p1517_p10), [#allocation4], 256   ;;  %p1518_p4 = pmov %p1517_p10 }
  0x49   : > { %1151 = vsyncadd (%p1518_p4), [#allocation4], 4294967040  ;;  %p1519_p11 = pmov %p1518_p4 }
  0x4a   : > { %p1520_p1 = pmov %p1518_p4 }
  0x4b   : > { %1153 = dma.done.wait (%p1519_p11), [#allocation7], 2048  }
  0x4c   : > { %1155 = vsyncadd (%p1520_p1), [#allocation7], 4294965248  ;;  %s343_s1 = sand.u32 1, %s1269_s30   ;;  %s1377_s24 = sand.u32 1, %s1170_s25  }
  0x4d   : > { %s804_s29 = sshll.u32 %s1377_s24, 7  ;;  %s344_s14 = scalar_lea.sflag [#allocation4], %s343_s1 }
  0x4e   : > { %s1380_s20 = scalar_lea.vmem [#allocation8], %s804_s29 }
  0x4f   : > { %1157 = dma.done.wait (%p1286_p7), %s344_s14, 2048  }
  0x50   : > { %1159 = vsyncadd (%p1286_p7), %s344_s14, 4294965248  ;;  %s805_s23 = sshll.u32 %s1377_s24, 4  ;;  %p388_p12 = scmp.lt.s32.totalorder %s1178_s27, 3 }
  0x51   : > { %s1395_s21 = scalar_lea.vmem [#allocation9], %s805_s23  ;;  %p806_p2 = scmp.ne.s32.totalorder %s1178_s27, 0 }
  0x52   : > { %s1389_s17 = scalar_select %p388_p12, %s1178_s27, 3 }
  0x53   : > { %399 = sbr.rel (%p806_p2) target bundleno = 649 (0x289), region = 64 }
  0x54   : > { %s390_s18 = scalar_lea.vmem %s1490_s6, %s1389_s17 }
  0x58   : > { %v417_v0 = vld [vmem:[#allocation6 + $0x78] sm:$0xff]  ;;  %v416_v1 = vld [vmem:[#allocation6 + $0x70] sm:$0xff]  ;;  %v415_v2 = vld [vmem:[#allocation6 + $0x68] sm:$0xff] }
  0x59   : > { %851 = vmatprep.subr.mxu0 %v417_v0  ;;  %v414_v3 = vld [vmem:[#allocation6 + $0x60] sm:$0xff]  ;;  %v400_v4 = vld [vmem:[#allocation3] sm:$0xff]  ;;  %v413_v5 = vld [vmem:[#allocation6 + $0x58] sm:$0xff] }
  0x5a   : > { %852 = vmatpush3.msra.mxu0 %v417_v0  ;;  %883 = vmatprep.mubr.f32.mxu0 %v400_v4  ;;  %v412_v6 = vld [vmem:[#allocation6 + $0x50] sm:$0xff]  ;;  %v411_v7 = vld [vmem:[#allocation6 + $0x48] sm:$0xff]  ;;  %v410_v8 = vld [vmem:[#allocation6 + $0x40] sm:$0xff] }
  0x5b   : > { %853 = vmatprep.subr.mxu0 %v416_v1  ;;  %v409_v9 = vld [vmem:[#allocation6 + $0x38] sm:$0xff]  ;;  %v408_v10 = vld [vmem:[#allocation6 + $0x30] sm:$0xff]  ;;  %v407_v11 = vld [vmem:[#allocation6 + $0x28] sm:$0xff] }
  0x5c   : > { %854 = vmatpush3.msra.mxu0 %v416_v1  ;;  %v406_v12 = vld [vmem:[#allocation6 + $0x20] sm:$0xff]  ;;  %v405_v13 = vld [vmem:[#allocation6 + $0x18] sm:$0xff]  ;;  %v404_v14 = vld [vmem:[#allocation6 + $0x10] sm:$0xff] }
  0x5d   : > { %855 = vmatprep.subr.mxu0 %v415_v2  ;;  %v403_v15 = vld [vmem:[#allocation6 + $0x8] sm:$0xff]  ;;  %v402_v16 = vld [vmem:[#allocation6] sm:$0xff]  ;;  %v401_v17 = vld [vmem:[#allocation3 + $0x8] sm:$0xff] }
  0x5e   : > { %856 = vmatpush3.msra.mxu0 %v415_v2  ;;  %v807_v18 = vld [vmem:[%s1486_s2] ss:$0 sm:$0xff] }
  0x5f   : > { %857 = vmatprep.subr.mxu0 %v414_v3  ;;  %v808_v48 = vld [vmem:[%s1487_s3] ss:$0 sm:$0xff] }
  0x60   : > { %858 = vmatpush3.msra.mxu0 %v414_v3  ;;  %v809_v50 = vld [vmem:[%s1488_s4] ss:$0 sm:$0xff] }
  0x61   : > { %859 = vmatprep.subr.mxu0 %v413_v5 }
  0x62   : > { %860 = vmatpush3.msra.mxu0 %v413_v5 }
  0x63   : > { %861 = vmatprep.subr.mxu0 %v412_v6 }
  0x64   : > { %862 = vmatpush3.msra.mxu0 %v412_v6 }
  0x65   : > { %863 = vmatprep.subr.mxu0 %v411_v7 }
  0x66   : > { %864 = vmatpush3.msra.mxu0 %v411_v7 }
  0x67   : > { %865 = vmatprep.subr.mxu0 %v410_v8 }
  0x68   : > { %866 = vmatpush3.msra.mxu0 %v410_v8 }
  0x69   : > { %867 = vmatprep.subr.mxu0 %v409_v9 }
  0x6a   : > { %868 = vmatpush3.msra.mxu0 %v409_v9 }
  0x6b   : > { %869 = vmatprep.subr.mxu0 %v408_v10 }
  0x6c   : > { %870 = vmatpush3.msra.mxu0 %v408_v10 }
  0x6d   : > { %871 = vmatprep.subr.mxu0 %v407_v11 }
  0x6e   : > { %872 = vmatpush3.msra.mxu0 %v407_v11 }
  0x6f   : > { %873 = vmatprep.subr.mxu0 %v406_v12 }
  0x70   : > { %874 = vmatpush3.msra.mxu0 %v406_v12 }
  0x71   : > { %875 = vmatprep.subr.mxu0 %v405_v13 }
  0x72   : > { %876 = vmatpush3.msra.mxu0 %v405_v13 }
  0x73   : > { %877 = vmatprep.subr.mxu0 %v404_v14 }
  0x74   : > { %878 = vmatpush3.msra.mxu0 %v404_v14 }
  0x75   : > { %879 = vmatprep.subr.mxu0 %v403_v15 }
  0x76   : > { %880 = vmatpush3.msra.mxu0 %v403_v15 }
  0x77   : > { %881 = vmatprep.subr.mxu0 %v402_v16 }
  0x78   : > { %882 = vmatpush3.msra.mxu0 %v402_v16 }
  0x79   : > { %884 = vmatmul.mubr.f32.vlgmr.msra.gmra.mxu0 %v401_v17 }
 0x139   : > { %v885_v19 = vpop.f32.mrf.mxu0 }
 0x13a   : > { %v497_v20 = vadd.f32 %v885_v19, %v807_v18 }
 0x13b   : > { %v491_v21 = vpop.f32.mrf.mxu0 }
 0x13c   : > { %v503_v22 = vmul.f32 0.70710677, %v497_v20  ;;  %v492_v23 = vadd.f32 %v807_v18, %v491_v21  ;;  %v501_v31 = vmul.f32 0.5, %v497_v20 }
 0x13e   : > { %v502_v24 = vmul.f32 0.70710677, %v492_v23  ;;  %1010 = verf.f32 %v503_v22  ;;  %v500_v27 = vmul.f32 0.5, %v492_v23 }
 0x140   : > { %1012 = verf.f32 %v502_v24 }
 0x14b   : > { %v1011_v25 = vpop.eup %1010 }
 0x14c   : > { %v507_v30 = vadd.f32 1.0, %v1011_v25 }
 0x14d   : > { %v1013_v26 = vpop.eup %1012 }
 0x14e   : > { %v506_v28 = vadd.f32 1.0, %v1013_v26  ;;  %v509_v32 = vmul.f32 %v507_v30, %v501_v31 }
 0x150   : > { %v508_v29 = vmul.f32 %v506_v28, %v500_v27 }
 0x152   : > { %510 = vadd.xlane.f32.xlu0 %v508_v29 }
 0x156   : > { %512 = vadd.xlane.f32.xlu0 %v509_v32 }
 0x1db   : > { %v511_v33 = vpop.xlane.xlu0 %510 }
 0x1dc   : > { %v515_v34 = vmul.f32 0.0078125, %v511_v33 }
 0x1de   : > { %v517_v35 = vsub.f32 %v508_v29, %v515_v34 }
 0x1df   : > { %v513_v36 = vpop.xlane.xlu0 %512 }
 0x1e0   : > { %v516_v37 = vmul.f32 0.0078125, %v513_v36  ;;  %v519_v38 = vmul.f32 %v517_v35, %v517_v35 }
 0x1e2   : > { %v518_v39 = vsub.f32 %v509_v32, %v516_v37  ;;  %521 = vadd.xlane.f32.xlu1 %v519_v38 }
 0x1e4   : > { %v520_v40 = vmul.f32 %v518_v39, %v518_v39 }
 0x1e6   : > { %523 = vadd.xlane.f32.xlu1 %v520_v40 }
 0x26b   : > { %v522_v41 = vpop.xlane.xlu1 %521 }
 0x26c   : > { %v525_v42 = vmul.f32 0.0078125, %v522_v41 }
 0x26e   : > { %v527_v43 = vadd.f32 1e-12, %v525_v42 }
 0x26f   : > { %v524_v44 = vpop.xlane.xlu1 %523 }
 0x270   : > { %1014 = vrsqrt.f32 %v527_v43  ;;  %v526_v45 = vmul.f32 0.0078125, %v524_v44 }
 0x272   : > { %v528_v46 = vadd.f32 1e-12, %v526_v45 }
 0x274   : > { %1016 = vrsqrt.f32 %v528_v46 }
 0x27d   : > { %v1015_v47 = vpop.eup %1014 }
 0x27e   : > { %v531_v49 = vmul.f32 %v1015_v47, %v517_v35 }
 0x280   : > { %v540_v51 = vmul.f32 %v808_v48, %v531_v49 }
 0x281   : > { %v1017_v52 = vpop.eup %1016 }
 0x282   : > { %v549_v53 = vadd.f32 %v809_v50, %v540_v51  ;;  %v532_v54 = vmul.f32 %v1017_v52, %v518_v39 }
 0x284   : > { %551 = vst [vmem:[#allocation2] sm:$0xff] %v549_v53  ;;  %v541_v55 = vmul.f32 %v808_v48, %v532_v54 }
 0x286   : > { %v550_v56 = vadd.f32 %v809_v50, %v541_v55 }
 0x288   : > { %552 = vst [vmem:[#allocation2 + $0x8] sm:$0xff] %v550_v56 }
 0x289 PF: > { %v570_v57 = vld [vmem:[%s1380_s20 + $0x78] sm:$0xff]  ;;  %v569_v58 = vld [vmem:[%s1380_s20 + $0x70] sm:$0xff]  ;;  %v568_v59 = vld [vmem:[%s1380_s20 + $0x68] sm:$0xff]  ;;  %s812_s29 = sshll.u32 %s1178_s27, 7  ;;  %s673_s14 = sshll.u32 %s1395_s21, 4  ;;  %s1435_s14 = int_to_ptr.vmem [resolvable:$true] %s673_s14 }
 0x28a   : > { %886 = vmatprep.subr.mxu0 %v570_v57  ;;  %v567_v60 = vld [vmem:[%s1380_s20 + $0x60] sm:$0xff]  ;;  %v566_v62 = vld [vmem:[%s1380_s20 + $0x58] sm:$0xff]  ;;  %v565_v63 = vld [vmem:[%s1380_s20 + $0x50] sm:$0xff]  ;;  %s1433_s30 = scalar_lea.hbm %s1491_s7, %s812_s29  ;;  %s656_s17 = scalar_lea.sflag [#allocation5], %s1377_s24 }
 0x28b   : > { %887 = vmatpush3.msra.mxu0 %v570_v57  ;;  %v553_v61 = vld [vmem:[#allocation2] sm:$0xff]  ;;  %v564_v0 = vld [vmem:[%s1380_s20 + $0x48] sm:$0xff]  ;;  %v562_v2 = vld [vmem:[%s1380_s20 + $0x38] sm:$0xff]  ;;  %s1098_s15 = scalar_lea.vmem %s1435_s14, 256  ;;  %p1521_p13 = scmp.ne.s32.totalorder %s1506_s12, 0 }
 0x28c   : > { %888 = vmatprep.subr.mxu0 %v569_v58  ;;  %918 = vmatprep.mubr.f32.mxu0 %v553_v61  ;;  %v563_v1 = vld [vmem:[%s1380_s20 + $0x40] sm:$0xff]  ;;  %v561_v3 = vld [vmem:[%s1380_s20 + $0x30] sm:$0xff]  ;;  %v560_v4 = vld [vmem:[%s1380_s20 + $0x28] sm:$0xff]  ;;  %p1099_p7 = scmp.ne.s32.totalorder %s1435_s14, %s1098_s15  ;;  %s1194_s27 = smov [#allocation9]  }
 0x28d   : > { %889 = vmatpush3.msra.mxu0 %v569_v58  ;;  %v559_v5 = vld [vmem:[%s1380_s20 + $0x20] sm:$0xff]  ;;  %v558_v6 = vld [vmem:[%s1380_s20 + $0x18] sm:$0xff]  ;;  %v557_v7 = vld [vmem:[%s1380_s20 + $0x10] sm:$0xff] }
 0x28e   : > { %890 = vmatprep.subr.mxu0 %v568_v59  ;;  %v556_v8 = vld [vmem:[%s1380_s20 + $0x8] sm:$0xff]  ;;  %v555_v9 = vld [vmem:[%s1380_s20] sm:$0xff]  ;;  %p1100_p5 = pnand %p1099_p7, %p1521_p13 }
 0x28f   : > { %891 = vmatpush3.msra.mxu0 %v568_v59  ;;  %v554_v10 = vld [vmem:[#allocation2 + $0x8] sm:$0xff]  ;;  %v810_v11 = vld [vmem:[%s390_s18] ss:$0 sm:$0xff]  ;;  %s1102_s18 = sshll.u32 %s1194_s27, 4  ;;  %s1103_s18 = int_to_ptr.vmem [resolvable:$false] %s1102_s18 }
 0x290   : > { %892 = vmatprep.subr.mxu0 %v567_v60  ;;  %p1101_p0 = pneg %p1100_p5  ;;  %s1104_s11 = scalar_lea.vmem %s1103_s18, 512 }
 0x291   : > { %893 = vmatpush3.msra.mxu0 %v567_v60  ;;  %p1105_p3 = scmp.lt.s32.totalorder %s1435_s14, %s1103_s18  ;;  %p1106_p9 = scmp.lt.s32.totalorder %s1104_s11, %s1098_s15 }
 0x292   : > { %894 = vmatprep.subr.mxu0 %v566_v62 }
 0x293   : > { %895 = vmatpush3.msra.mxu0 %v566_v62  ;;  %p1107_p8 = por %p1106_p9, %p1105_p3 }
 0x294   : > { %896 = vmatprep.subr.mxu0 %v565_v63 }
 0x295   : > { %897 = vmatpush3.msra.mxu0 %v565_v63  ;;  %p1108_p6 = pnand %p1107_p8, %p1101_p0 }
 0x296   : > { %898 = vmatprep.subr.mxu0 %v564_v0 }
 0x297   : > { %899 = vmatpush3.msra.mxu0 %v564_v0 }
 0x298   : > { %900 = vmatprep.subr.mxu0 %v563_v1 }
 0x299   : > { %901 = vmatpush3.msra.mxu0 %v563_v1 }
 0x29a   : > { %902 = vmatprep.subr.mxu0 %v562_v2 }
 0x29b   : > { %903 = vmatpush3.msra.mxu0 %v562_v2 }
 0x29c   : > { %904 = vmatprep.subr.mxu0 %v561_v3 }
 0x29d   : > { %905 = vmatpush3.msra.mxu0 %v561_v3 }
 0x29e   : > { %906 = vmatprep.subr.mxu0 %v560_v4 }
 0x29f   : > { %907 = vmatpush3.msra.mxu0 %v560_v4 }
 0x2a0   : > { %908 = vmatprep.subr.mxu0 %v559_v5 }
 0x2a1   : > { %909 = vmatpush3.msra.mxu0 %v559_v5 }
 0x2a2   : > { %910 = vmatprep.subr.mxu0 %v558_v6 }
 0x2a3   : > { %911 = vmatpush3.msra.mxu0 %v558_v6 }
 0x2a4   : > { %912 = vmatprep.subr.mxu0 %v557_v7 }
 0x2a5   : > { %913 = vmatpush3.msra.mxu0 %v557_v7 }
 0x2a6   : > { %914 = vmatprep.subr.mxu0 %v556_v8 }
 0x2a7   : > { %915 = vmatpush3.msra.mxu0 %v556_v8 }
 0x2a8   : > { %916 = vmatprep.subr.mxu0 %v555_v9 }
 0x2a9   : > { %917 = vmatpush3.msra.mxu0 %v555_v9 }
 0x2aa   : > { %919 = vmatmul.mubr.f32.vlgmr.msra.gmra.mxu0 %v554_v10 }
 0x36a   : > { %v920_v12 = vpop.f32.mrf.mxu0 }
 0x36b   : > { %v650_v13 = vadd.f32 %v920_v12, %v810_v11 }
 0x36c   : > { %v644_v14 = vpop.f32.mrf.mxu0 }
 0x36d   : > { %654 = vst [vmem:[%s1395_s21 + $0x8] sm:$0xff] %v650_v13  ;;  %v645_v15 = vadd.f32 %v810_v11, %v644_v14 }
 0x36f   : > { %653 = vst [vmem:[%s1395_s21] sm:$0xff] %v645_v15 }
 0x370   : > { %1111 = shalt.err (!%p1108_p6)
}
 0x371   : > { %s1112_s21 = scalar_lea.hbm %s1433_s30, 256  ;;  %s1116_s9 = scalar_lea.hbm %s1491_s7, 1024 }
 0x372   : > { %p1113_p10 = scmp.ne.s32.totalorder %s1433_s30, %s1112_s21  ;;  %p1117_p1 = scmp.lt.s32.totalorder %s1433_s30, %s1491_s7 }
 0x373   : > { %p1118_p12 = scmp.lt.s32.totalorder %s1116_s9, %s1112_s21 }
 0x374   : > { %p1114_p4 = pnand %p1113_p10, %p1521_p13 }
 0x375   : > { %p1119_p2 = por %p1118_p12, %p1117_p1 }
 0x376   : > { %p1115_p11 = pneg %p1114_p4 }
 0x378   : > { %p1120_p7 = pnand %p1119_p2, %p1115_p11 }
 0x37a   : > { %1123 = shalt.err (!%p1120_p7)
}
 0x37b   : > { %s1195_s8 = smov 128   ;;  %s1196_s1 = smov 512  }
 0x37c   : > { %s1197_s29 = smov 8  }
 0x37d   : > { %931 = dma.vmem_to_hbm [thread:$0]  (%p1521_p13), %s1435_s14, 256, %s1433_s30, %s656_s17, %s1195_s8, %s1196_s1, %s1197_s29  }
 0x37e PF: > { %s1522_s23 = sld [smem:[#allocation15_spill]] }
 0x37f   : > { %s1523_s20 = sld [smem:[#allocation14_spill]] }
 0x380   : > { %s1524_s15 = sld [smem:[#allocation16_spill]] }
 0x384   : > { %p953_p5 = scmp.ge.s32.totalorder %s1522_s23, 2 }
 0x385   : > { %s688_s27 = sand.u32 1, %s1523_s20  }
 0x386   : > { %p1525_p0 = scmp.ne.s32.totalorder %s1524_s15, 0  ;;  %s689_s18 = scalar_lea.sflag [#allocation5], %s688_s27 }
 0x388   : > { %p945_p3 = pnand %p953_p5, %p1525_p0 }
 0x38a   : > { %p946_p9 = pneg %p945_p3 }
 0x38c   : > { %1161 = dma.done.wait (%p946_p9), %s689_s18, 256  }
 0x38d   : > { %1163 = vsyncadd (%p946_p9), %s689_s18, 4294967040  ;;  %s22_s29 = sadd.s32 1, %s1522_s23   ;;  %s1526_s24 = smov %s1170_s25 }
 0x38e   : > { %p19_p8 = scmp.ge.s32.totalorder %s22_s29, 6   ;;  %s1527_s25 = smov %s1174_s26 }
 0x38f   : > { %s1528_s26 = smov %s1357_s22  ;;  %s1529_s27 = smov %s1182_s28 }
 0x390   : > { %s1530_s28 = smov %s1532_s16  ;;  %21 = sbr.rel (!%p19_p8) target bundleno = 9 (0x9), region = 108 }
 0x395   :  { %694 = vsyncpa [#allocation4], 1 }
 0x396   :  { %696 = vsyncpa [#allocation4 + $0x1], 1 }
 0x397   :  { %697 = vsyncpa [#allocation7], 1 }
 0x398   :  { %698 = vsyncpa [#allocation5], 1 }
 0x399   :  { %700 = vsyncpa [#allocation5 + $0x1], 1 }

</bundles_post_ra>
